<compile_context>
chip_gen: v6e
topology: v6e:2x2x1
jax: 0.10.0
libtpu: 0.0.40
codegen_flags: <defaults>
</compile_context>

<pallas_src>
import functools
import math

import jax
import jax.numpy as jnp
from jax.experimental import pallas as pl
from jax.experimental.pallas import tpu as pltpu

LANE = 128


def _round_up(x, m):
    return ((x + m - 1) // m) * m


def _iou_loss_kernel(pred_ref, tgt_ref, *out_refs,
                     loss_type, xyxy, n_valid, tile_rows, need_elem, need_sum):
    """IoU/GIoU/DIoU/CIoU loss over a (4, tile_rows, 128) coordinate-planar tile."""
    eps = 1e-16

    # Each coordinate is a sublane-dense (tile_rows, 128) slab.
    if xyxy:
        b1_x1, b1_y1, b1_x2, b1_y2 = pred_ref[0], pred_ref[1], pred_ref[2], pred_ref[3]
        b2_x1, b2_y1, b2_x2, b2_y2 = tgt_ref[0], tgt_ref[1], tgt_ref[2], tgt_ref[3]
        w1, h1 = b1_x2 - b1_x1, b1_y2 - b1_y1 + eps
        w2, h2 = b2_x2 - b2_x1, b2_y2 - b2_y1 + eps
    else:
        x1, y1, w1, h1 = pred_ref[0], pred_ref[1], pred_ref[2], pred_ref[3]
        x2, y2, w2, h2 = tgt_ref[0], tgt_ref[1], tgt_ref[2], tgt_ref[3]
        w1_, h1_, w2_, h2_ = w1 * 0.5, h1 * 0.5, w2 * 0.5, h2 * 0.5
        b1_x1, b1_x2, b1_y1, b1_y2 = x1 - w1_, x1 + w1_, y1 - h1_, y1 + h1_
        b2_x1, b2_x2, b2_y1, b2_y2 = x2 - w2_, x2 + w2_, y2 - h2_, y2 + h2_

    inter = (jnp.maximum(jnp.minimum(b1_x2, b2_x2) - jnp.maximum(b1_x1, b2_x1), 0.0)
             * jnp.maximum(jnp.minimum(b1_y2, b2_y2) - jnp.maximum(b1_y1, b2_y1), 0.0))
    union = w1 * h1 + w2 * h2 - inter + eps
    iou = inter * pl.reciprocal(union, approx=True)       # divide -> EUP

    if loss_type in ("giou", "ciou", "diou"):
        cw = jnp.maximum(b1_x2, b2_x2) - jnp.minimum(b1_x1, b2_x1)
        ch = jnp.maximum(b1_y2, b2_y2) - jnp.minimum(b1_y1, b2_y1)
        if loss_type in ("ciou", "diou"):
            c2 = cw * cw + ch * ch + eps
            rho2 = ((b2_x1 + b2_x2 - b1_x1 - b1_x2) ** 2
                    + (b2_y1 + b2_y2 - b1_y1 - b1_y2) ** 2) * 0.25
            if loss_type == "ciou":
                r1 = w1 * pl.reciprocal(h1, approx=True)
                r2 = w2 * pl.reciprocal(h2, approx=True)
                # atan(r2) - atan(r1) == atan((r2-r1)/(1+r1*r2)) for r1*r2 > -1
                # (aspect ratios of valid boxes are positive) -> one arctan.
                datan = jnp.arctan((r2 - r1) * pl.reciprocal(1.0 + r1 * r2, approx=True))
                v = (4.0 / (math.pi ** 2)) * (datan * datan)
                # torch.no_grad() around alpha -> same forward value.
                alpha = jax.lax.stop_gradient(
                    v * pl.reciprocal(v - iou + (1.0 + eps), approx=True))
                iou = iou - (rho2 * pl.reciprocal(c2, approx=True) + v * alpha)
            else:  # diou
                iou = iou - rho2 * pl.reciprocal(c2, approx=True)
        else:      # giou
            c_area = cw * ch + eps
            iou = iou - (c_area - union) * pl.reciprocal(c_area, approx=True)

    idx = 0
    if need_elem:
        out_refs[idx][...] = iou                            # (tile_rows, 128)
        idx += 1
    if need_sum:
        loss = 1.0 - iou
        # In-kernel validity mask (no mask array in HBM); jnp.where also
        # guards against NaN from padded zero boxes (e.g. xywh + ciou).
        row = jax.lax.broadcasted_iota(jnp.int32, (tile_rows, LANE), 0)
        lane = jax.lax.broadcasted_iota(jnp.int32, (tile_rows, LANE), 1)
        gidx = (pl.program_id(0) * tile_rows + row) * LANE + lane
        masked = jnp.where(gidx < n_valid, loss, 0.0)
        # Per-tile partial sum reduced to an (8, 128) slab with aligned
        # vector adds (keeps the grid axis "parallel"; host finishes the sum).
        part = masked[0:8]
        for k in range(1, tile_rows // 8):
            part = part + masked[k * 8:(k + 1) * 8]
        out_refs[idx][0] = part


def iou_loss(pred, target, *, reduction="none", loss_type="iou", xyxy=True,
             return_iou=False, tile_rows=256):
    """JAX/Pallas equivalent of IOUloss.forward(pred, target, return_iou)."""
    if loss_type not in ("iou", "giou", "ciou", "diou"):
        raise KeyError(f"loss_type: {loss_type} is not supported.")
    if reduction not in ("mean", "sum", "none"):
        raise KeyError(f"reduction: {reduction} is not supported.")
    if pred.shape[0] != target.shape[0]:
        raise ValueError(
            f"the number of predections ({pred.shape[0]}) and the number of "
            f"targets ({target.shape[0]}) are not the same.")

    pred2 = jnp.asarray(pred).reshape(-1, 4).astype(jnp.float32)
    tgt2 = jnp.asarray(target).reshape(-1, 4).astype(jnp.float32)
    n = pred2.shape[0]

    need_elem = (reduction == "none") or return_iou
    need_sum = reduction in ("mean", "sum")

    # Rows of 128 boxes, padded so the row count is a multiple of 8 (full
    # sublanes) and, when tiled, a multiple of the tile size.
    tile_rows = max(8, _round_up(int(tile_rows), 8))
    n_rows = _round_up(_round_up(max(n, 1), LANE) // LANE, 8)
    if n_rows > tile_rows:
        n_rows = _round_up(n_rows, tile_rows)
        tile_r = tile_rows
    else:
        tile_r = n_rows
    num_tiles = n_rows // tile_r
    npad = n_rows * LANE

    def pack(x2):  # (N, 4) -> (4, n_rows, 128), single transpose + pad + reshape
        xt = jnp.pad(x2.T, ((0, 0), (0, npad - n)))
        return xt.reshape(4, n_rows, LANE)

    pred_t = pack(pred2)
    tgt_t = pack(tgt2)

    in_spec = pl.BlockSpec((4, tile_r, LANE), lambda i: (0, i, 0))
    out_shapes, out_specs = [], []
    if need_elem:
        out_shapes.append(jax.ShapeDtypeStruct((n_rows, LANE), jnp.float32))
        out_specs.append(pl.BlockSpec((tile_r, LANE), lambda i: (i, 0)))
    if need_sum:
        out_shapes.append(jax.ShapeDtypeStruct((num_tiles, 8, LANE), jnp.float32))
        out_specs.append(pl.BlockSpec((1, 8, LANE), lambda i: (i, 0, 0)))

    kernel = functools.partial(
        _iou_loss_kernel, loss_type=loss_type, xyxy=xyxy, n_valid=n,
        tile_rows=tile_r, need_elem=need_elem, need_sum=need_sum)

    outs = pl.pallas_call(
        kernel,
        grid=(num_tiles,),
        in_specs=[in_spec, in_spec],
        out_specs=tuple(out_specs),
        out_shape=tuple(out_shapes),
        compiler_params=pltpu.CompilerParams(
            dimension_semantics=("parallel",)),
    )(pred_t, tgt_t)
    if not isinstance(outs, (list, tuple)):
        outs = (outs,)

    idx = 0
    iou = None
    loss_sum = None
    if need_elem:
        iou = outs[idx].reshape(-1)[:n].reshape(n, 1)   # matches torch chunk(4,1) -> (N,1)
        idx += 1
    if need_sum:
        loss_sum = jnp.sum(outs[idx])
        idx += 1

    if reduction == "mean":
        loss = loss_sum / n
    elif reduction == "sum":
        loss = loss_sum
    else:
        loss = 1.0 - iou   # trivial host-side op; avoids a second per-box output

    if return_iou:
        return loss, iou
    return loss


# ----------------------------------------------------------------------------
# Pure-JAX reference (mirrors the torch module) for correctness checking.
# ----------------------------------------------------------------------------
def _iou_loss_ref(pred, target, *, reduction="none", loss_type="iou", xyxy=True):
    eps = 1e-16
    pred = jnp.asarray(pred).reshape(-1, 4).astype(jnp.float32)
    target = jnp.asarray(target).reshape(-1, 4).astype(jnp.float32)
    if xyxy:
        b1_x1, b1_y1, b1_x2, b1_y2 = [pred[:, i:i + 1] for i in range(4)]
        b2_x1, b2_y1, b2_x2, b2_y2 = [target[:, i:i + 1] for i in range(4)]
        w1, h1 = b1_x2 - b1_x1, b1_y2 - b1_y1 + eps
        w2, h2 = b2_x2 - b2_x1, b2_y2 - b2_y1 + eps
    else:
        x1, y1, w1, h1 = [pred[:, i:i + 1] for i in range(4)]
        x2, y2, w2, h2 = [target[:, i:i + 1] for i in range(4)]
        b1_x1, b1_x2, b1_y1, b1_y2 = x1 - w1 / 2, x1 + w1 / 2, y1 - h1 / 2, y1 + h1 / 2
        b2_x1, b2_x2, b2_y1, b2_y2 = x2 - w2 / 2, x2 + w2 / 2, y2 - h2 / 2, y2 + h2 / 2
    inter = (jnp.maximum(jnp.minimum(b1_x2, b2_x2) - jnp.maximum(b1_x1, b2_x1), 0.0)
             * jnp.maximum(jnp.minimum(b1_y2, b2_y2) - jnp.maximum(b1_y1, b2_y1), 0.0))
    union = w1 * h1 + w2 * h2 - inter + eps
    iou = inter / union
    if loss_type in ("giou", "ciou", "diou"):
        cw = jnp.maximum(b1_x2, b2_x2) - jnp.minimum(b1_x1, b2_x1)
        ch = jnp.maximum(b1_y2, b2_y2) - jnp.minimum(b1_y1, b2_y1)
        if loss_type in ("ciou", "diou"):
            c2 = cw ** 2 + ch ** 2 + eps
            rho2 = ((b2_x1 + b2_x2 - b1_x1 - b1_x2) ** 2
                    + (b2_y1 + b2_y2 - b1_y1 - b1_y2) ** 2) / 4
            if loss_type == "ciou":
                v = 4 / math.pi ** 2 * (jnp.arctan(w2 / h2) - jnp.arctan(w1 / h1)) ** 2
                alpha = v / (v - iou + (1 + eps))
                iou = iou - (rho2 / c2 + v * alpha)
            else:
                iou = iou - rho2 / c2
        else:
            c_area = cw * ch + eps
            iou = iou - (c_area - union) / c_area
    loss = 1 - iou
    if reduction == "mean":
        loss = loss.mean()
    elif reduction == "sum":
        loss = loss.sum()
    return loss, iou


if __name__ == "__main__":
    import numpy as np

    key = jax.random.PRNGKey(0)
    kp, kt, kc, kw = jax.random.split(key, 4)

    def make_xyxy(k, n):
        k1, k2 = jax.random.split(k)
        xy = jax.random.uniform(k1, (n, 2), minval=0.0, maxval=10.0)
        wh = jax.random.uniform(k2, (n, 2), minval=0.5, maxval=5.0)
        return jnp.concatenate([xy, xy + wh], axis=1)      # (n, 4) xyxy

    def make_xywh(k, n):
        k1, k2 = jax.random.split(k)
        c = jax.random.uniform(k1, (n, 2), minval=2.0, maxval=8.0)
        wh = jax.random.uniform(k2, (n, 2), minval=0.5, maxval=5.0)
        return jnp.concatenate([c, wh], axis=1)            # (n, 4) cxcywh

    tol = dict(rtol=2e-2, atol=2e-2)  # loose: approx EUP reciprocals in-kernel

    n = 8
    pred = make_xyxy(kp, n)
    target = make_xyxy(kt, n)

    # 'none' reduction, plain IoU, also return per-box IoU.
    loss_none, iou = iou_loss(pred, target, reduction="none",
                              loss_type="iou", xyxy=True, return_iou=True)
    r_loss, r_iou = _iou_loss_ref(pred, target, reduction="none", loss_type="iou")
    assert loss_none.shape == (n, 1) and iou.shape == (n, 1)
    np.testing.assert_allclose(np.asarray(loss_none), np.asarray(r_loss), **tol)
    np.testing.assert_allclose(np.asarray(iou), np.asarray(r_iou), **tol)

    # 'mean' reduction with CIoU.
    loss_mean = iou_loss(pred, target, reduction="mean", loss_type="ciou", xyxy=True)
    r_mean, _ = _iou_loss_ref(pred, target, reduction="mean", loss_type="ciou")
    assert loss_mean.shape == ()
    np.testing.assert_allclose(np.asarray(loss_mean), np.asarray(r_mean), **tol)

    # 'sum' reduction with GIoU.
    loss_sum = iou_loss(pred, target, reduction="sum", loss_type="giou", xyxy=True)
    r_sum, _ = _iou_loss_ref(pred, target, reduction="sum", loss_type="giou")
    assert loss_sum.shape == ()
    np.testing.assert_allclose(np.asarray(loss_sum), np.asarray(r_sum), **tol)

    # Multi-tile grid + in-kernel masking + xywh path (exercises NaN-safe
    # padding for CIoU) with a small tile so the grid has >1 step.
    n_big = 1500
    pred_b = make_xywh(kc, n_big)
    target_b = make_xywh(kw, n_big)
    loss_big, iou_big = iou_loss(pred_b, target_b, reduction="mean",
                                 loss_type="ciou", xyxy=False,
                                 return_iou=True, tile_rows=8)
    r_big, r_iou_big = _iou_loss_ref(pred_b, target_b, reduction="mean",
                                     loss_type="ciou", xyxy=False)
    np.testing.assert_allclose(np.asarray(loss_big), np.asarray(r_big), **tol)
    np.testing.assert_allclose(np.asarray(iou_big), np.asarray(r_iou_big), **tol)

    loss_d = iou_loss(pred_b, target_b, reduction="sum", loss_type="diou",
                      xyxy=False, tile_rows=8)
    r_d, _ = _iou_loss_ref(pred_b, target_b, reduction="sum",
                           loss_type="diou", xyxy=False)
    np.testing.assert_allclose(np.asarray(loss_d), np.asarray(r_d), **tol)

    jax.block_until_ready((loss_none, iou, loss_mean, loss_sum, loss_big, loss_d))
    print("KERNEL_OK")
</pallas_src>

<mosaic_0001>
module attributes {stable_mosaic.version = 11 : i64} {
  func.func @_iou_loss_kernel(%arg0: i32, %arg1: memref<4x8x128xf32, #tpu.memory_space<vmem>>, %arg2: memref<4x8x128xf32, #tpu.memory_space<vmem>>, %arg3: memref<8x128xf32, #tpu.memory_space<vmem>>) attributes {dimension_semantics = [#tpu.dimension_semantics<parallel>], iteration_bounds = array<i64: 1>, scalar_prefetch = 0 : i64, scratch_operands = 0 : i64, tpu.core_type = #tpu.core_type<tc>, window_params = [{transform_indices = @transform_0, window_bounds = array<i64: 4, 8, 128>}, {transform_indices = @transform_1, window_bounds = array<i64: 4, 8, 128>}, {transform_indices = @transform_2, window_bounds = array<i64: 8, 128>}]} {
    %c0 = arith.constant 0 : index
    %c0_0 = arith.constant 0 : index
    %c0_1 = arith.constant 0 : index
    %0 = vector.load %arg1[%c0, %c0_0, %c0_1] : memref<4x8x128xf32, #tpu.memory_space<vmem>>, vector<1x8x128xf32>
    %1 = vector.shape_cast %0 : vector<1x8x128xf32> to vector<8x128xf32>
    %c1 = arith.constant 1 : index
    %c0_2 = arith.constant 0 : index
    %c0_3 = arith.constant 0 : index
    %2 = vector.load %arg1[%c1, %c0_2, %c0_3] : memref<4x8x128xf32, #tpu.memory_space<vmem>>, vector<1x8x128xf32>
    %3 = vector.shape_cast %2 : vector<1x8x128xf32> to vector<8x128xf32>
    %c2 = arith.constant 2 : index
    %c0_4 = arith.constant 0 : index
    %c0_5 = arith.constant 0 : index
    %4 = vector.load %arg1[%c2, %c0_4, %c0_5] : memref<4x8x128xf32, #tpu.memory_space<vmem>>, vector<1x8x128xf32>
    %5 = vector.shape_cast %4 : vector<1x8x128xf32> to vector<8x128xf32>
    %c3 = arith.constant 3 : index
    %c0_6 = arith.constant 0 : index
    %c0_7 = arith.constant 0 : index
    %6 = vector.load %arg1[%c3, %c0_6, %c0_7] : memref<4x8x128xf32, #tpu.memory_space<vmem>>, vector<1x8x128xf32>
    %7 = vector.shape_cast %6 : vector<1x8x128xf32> to vector<8x128xf32>
    %c0_8 = arith.constant 0 : index
    %c0_9 = arith.constant 0 : index
    %c0_10 = arith.constant 0 : index
    %8 = vector.load %arg2[%c0_8, %c0_9, %c0_10] : memref<4x8x128xf32, #tpu.memory_space<vmem>>, vector<1x8x128xf32>
    %9 = vector.shape_cast %8 : vector<1x8x128xf32> to vector<8x128xf32>
    %c1_11 = arith.constant 1 : index
    %c0_12 = arith.constant 0 : index
    %c0_13 = arith.constant 0 : index
    %10 = vector.load %arg2[%c1_11, %c0_12, %c0_13] : memref<4x8x128xf32, #tpu.memory_space<vmem>>, vector<1x8x128xf32>
    %11 = vector.shape_cast %10 : vector<1x8x128xf32> to vector<8x128xf32>
    %c2_14 = arith.constant 2 : index
    %c0_15 = arith.constant 0 : index
    %c0_16 = arith.constant 0 : index
    %12 = vector.load %arg2[%c2_14, %c0_15, %c0_16] : memref<4x8x128xf32, #tpu.memory_space<vmem>>, vector<1x8x128xf32>
    %13 = vector.shape_cast %12 : vector<1x8x128xf32> to vector<8x128xf32>
    %c3_17 = arith.constant 3 : index
    %c0_18 = arith.constant 0 : index
    %c0_19 = arith.constant 0 : index
    %14 = vector.load %arg2[%c3_17, %c0_18, %c0_19] : memref<4x8x128xf32, #tpu.memory_space<vmem>>, vector<1x8x128xf32>
    %15 = vector.shape_cast %14 : vector<1x8x128xf32> to vector<8x128xf32>
    %16 = arith.subf %5, %1 : vector<8x128xf32>
    %17 = arith.subf %7, %3 : vector<8x128xf32>
    %cst = arith.constant 1.000000e-16 : f32
    %18 = vector.broadcast %cst : f32 to vector<8x128xf32>
    %19 = arith.addf %17, %18 : vector<8x128xf32>
    %20 = arith.subf %13, %9 : vector<8x128xf32>
    %21 = arith.subf %15, %11 : vector<8x128xf32>
    %cst_20 = arith.constant 1.000000e-16 : f32
    %22 = vector.broadcast %cst_20 : f32 to vector<8x128xf32>
    %23 = arith.addf %21, %22 : vector<8x128xf32>
    %24 = arith.minimumf %5, %13 : vector<8x128xf32>
    %25 = arith.maximumf %1, %9 : vector<8x128xf32>
    %26 = arith.subf %24, %25 : vector<8x128xf32>
    %cst_21 = arith.constant 0.000000e+00 : f32
    %27 = vector.broadcast %cst_21 : f32 to vector<8x128xf32>
    %28 = arith.maximumf %26, %27 : vector<8x128xf32>
    %29 = arith.minimumf %7, %15 : vector<8x128xf32>
    %30 = arith.maximumf %3, %11 : vector<8x128xf32>
    %31 = arith.subf %29, %30 : vector<8x128xf32>
    %cst_22 = arith.constant 0.000000e+00 : f32
    %32 = vector.broadcast %cst_22 : f32 to vector<8x128xf32>
    %33 = arith.maximumf %31, %32 : vector<8x128xf32>
    %34 = arith.mulf %28, %33 : vector<8x128xf32>
    %35 = arith.mulf %16, %19 : vector<8x128xf32>
    %36 = arith.mulf %20, %23 : vector<8x128xf32>
    %37 = arith.addf %35, %36 : vector<8x128xf32>
    %38 = arith.subf %37, %34 : vector<8x128xf32>
    %cst_23 = arith.constant 1.000000e-16 : f32
    %39 = vector.broadcast %cst_23 : f32 to vector<8x128xf32>
    %40 = arith.addf %38, %39 : vector<8x128xf32>
    %41 = tpu.reciprocal %40 {approx = true} : vector<8x128xf32> -> vector<8x128xf32>
    %42 = arith.mulf %34, %41 : vector<8x128xf32>
    %c0_24 = arith.constant 0 : index
    %c0_25 = arith.constant 0 : index
    %43 = vector.load %arg3[%c0_24, %c0_25] : memref<8x128xf32, #tpu.memory_space<vmem>>, vector<8x128xf32>
    tpu.vector_store %arg3[%c0_24, %c0_25], %42 {strides = array<i32>} : memref<8x128xf32, #tpu.memory_space<vmem>>, vector<8x128xf32>,
    return
  }
  func.func @transform_0(%arg0: i32) -> (i32, i32, i32) {
    %c0_i32 = arith.constant 0 : i32
    %c0_i32_0 = arith.constant 0 : i32
    %c0_i32_1 = arith.constant 0 : i32
    return %c0_i32, %arg0, %c0_i32_0 : i32, i32, i32
  }
  func.func @transform_1(%arg0: i32) -> (i32, i32, i32) {
    %c0_i32 = arith.constant 0 : i32
    %c0_i32_0 = arith.constant 0 : i32
    %c0_i32_1 = arith.constant 0 : i32
    return %c0_i32, %arg0, %c0_i32_0 : i32, i32, i32
  }
  func.func @transform_2(%arg0: i32) -> (i32, i32) {
    %c0_i32 = arith.constant 0 : i32
    %c0_i32_0 = arith.constant 0 : i32
    return %arg0, %c0_i32 : i32, i32
  }
}

</mosaic_0001>

<bundles_post_ra>
// kernel: tpu_custom_call.1
= control target key start
LH: loop header
LB: loop body
LE: loop exit
PB: predicated region body
PF: predicated region fallthrough
CT: control target
= control target key end

     0   :  { %7 = vsyncpa [#allocation3], 0  ;;  %s195_s0 = inlined_call_operand.hbm [shape: f32[4,8,128], index: 0, kind: input, shape index: {}]   ;;  %s196_s1 = inlined_call_operand.hbm [shape: f32[4,8,128], index: 1, kind: input, shape index: {}]   ;;  %s197_s2 = inlined_call_operand.hbm [shape: f32[8,128], index: 2, kind: output, shape index: {}]  }
   0x1   :  { %8 = vsyncpa [#allocation6], 0 }
   0x2   :  { %9 = vsyncpa [#allocation4], 0  ;;  %s166_s9 = smov [#allocation2]  }
   0x3   :  { %s15_s10 = sshll.u32 %s166_s9, 4  ;;  %s16_s10 = int_to_ptr.vmem [resolvable:$true] %s15_s10 }
   0x4   :  { %s108_s11 = scalar_lea.vmem %s16_s10, 512  ;;  %p113_p1 = scmp.lt.s32.totalorder %s16_s10, %s16_s10 }
   0x5   :  { %p109_p0 = scmp.ne.s32.totalorder %s16_s10, %s108_s11  ;;  %p114_p2 = scmp.lt.s32.totalorder %s108_s11, %s108_s11 }
   0x7   :  { %p115_p3 = por %p114_p2, %p113_p1 }
   0x9   :  { %p116_p4 = pnand %p115_p3, %p109_p0 }
   0xb   :  { %119 = shalt.err (!%p116_p4)
}
   0xc   :  { %s167_s12 = smov 128   ;;  %s168_s13 = smov 8  }
   0xd   :  { %21 = dma.hbm_to_vmem [thread:$0]  %s195_s0, 512, %s16_s10, [#allocation3], %s167_s12, %s167_s12, %s168_s13  }
   0xe   :  { %s169_s16 = smov [#allocation5]  }
   0xf   :  { %s27_s17 = sshll.u32 %s169_s16, 4  ;;  %s28_s17 = int_to_ptr.vmem [resolvable:$true] %s27_s17 }
  0x10   :  { %s128_s18 = scalar_lea.vmem %s28_s17, 512  ;;  %p133_p6 = scmp.lt.s32.totalorder %s28_s17, %s28_s17 }
  0x11   :  { %p129_p5 = scmp.ne.s32.totalorder %s28_s17, %s128_s18  ;;  %p134_p7 = scmp.lt.s32.totalorder %s128_s18, %s128_s18 }
  0x13   :  { %p135_p8 = por %p134_p7, %p133_p6 }
  0x15   :  { %p136_p9 = pnand %p135_p8, %p129_p5 }
  0x17   :  { %139 = shalt.err (!%p136_p9)
}
  0x18   :  { %33 = dma.hbm_to_vmem [thread:$0]  %s196_s1, 512, %s28_s17, [#allocation6], %s167_s12, %s167_s12, %s168_s13  }
  0x19   :  { %160 = dma.done.wait [#allocation3], 512  }
  0x1a   :  { %161 = vsyncadd [#allocation3], 4294966784 }
  0x1b   :  { %162 = dma.done.wait [#allocation6], 512  }
  0x1c   :  { %163 = vsyncadd [#allocation6], 4294966784  ;;  %v40_v0 = vld [vmem:[#allocation2] sm:$0xff]  ;;  %v42_v1 = vld [vmem:[#allocation2 + $0x8] sm:$0xff]  ;;  %s170_s0 = smov [#allocation7]  }
  0x1d   :  { %v44_v2 = vld [vmem:[#allocation2 + $0x10] sm:$0xff]  ;;  %v46_v3 = vld [vmem:[#allocation2 + $0x18] sm:$0xff]  ;;  %v47_v4 = vld [vmem:[#allocation5] sm:$0xff]  ;;  %s83_s1 = sshll.u32 %s170_s0, 4  ;;  %s84_s1 = int_to_ptr.vmem [resolvable:$true] %s83_s1 }
  0x1e   :  { %v49_v5 = vld [vmem:[#allocation5 + $0x8] sm:$0xff]  ;;  %v51_v6 = vld [vmem:[#allocation5 + $0x10] sm:$0xff]  ;;  %v53_v7 = vld [vmem:[#allocation5 + $0x18] sm:$0xff]  ;;  %v54_v8 = vsub.f32 %v44_v2, %v40_v0  ;;  %v55_v9 = vsub.f32 %v46_v3, %v42_v1  ;;  %v61_v10 = vmax.f32 %v40_v0, %v47_v4  ;;  %s140_s21 = scalar_lea.vmem %s84_s1, 128  ;;  %p145_p11 = scmp.lt.s32.totalorder %s84_s1, %s84_s1 }
  0x1f   :  { %v65_v11 = vmax.f32 %v42_v1, %v49_v5  ;;  %v57_v12 = vsub.f32 %v51_v6, %v47_v4  ;;  %v58_v13 = vsub.f32 %v53_v7, %v49_v5  ;;  %v60_v14 = vmin.f32 %v44_v2, %v51_v6  ;;  %p141_p10 = scmp.ne.s32.totalorder %s84_s1, %s140_s21  ;;  %p146_p12 = scmp.lt.s32.totalorder %s140_s21, %s140_s21 }
  0x20   :  { %v64_v15 = vmin.f32 %v46_v3, %v53_v7  ;;  %v56_v16 = vadd.f32 1e-16, %v55_v9 }
  0x21   :  { %v59_v17 = vadd.f32 1e-16, %v58_v13  ;;  %v62_v18 = vsub.f32 %v60_v14, %v61_v10  ;;  %p147_p13 = por %p146_p12, %p145_p11 }
  0x22   :  { %v66_v19 = vsub.f32 %v64_v15, %v65_v11  ;;  %v69_v20 = vmul.f32 %v56_v16, %v54_v8 }
  0x23   :  { %v63_v21 = vmax.f32 %v62_v18, 0.0  ;;  %v70_v23 = vmul.f32 %v59_v17, %v57_v12  ;;  %p148_p0 = pnand %p147_p13, %p141_p10 }
  0x24   :  { %v67_v22 = vmax.f32 %v66_v19, 0.0 }
  0x25   :  { %v71_v25 = vadd.f32 %v70_v23, %v69_v20 }
  0x26   :  { %v68_v24 = vmul.f32 %v67_v22, %v63_v21 }
  0x28   :  { %v72_v26 = vsub.f32 %v71_v25, %v68_v24 }
  0x2a   :  { %v73_v27 = vadd.f32 1e-16, %v72_v26 }
  0x2c   :  { %98 = vrcp.f32 %v73_v27 }
  0x39   :  { %v99_v28 = vpop.eup %98 }
  0x3a   :  { %v75_v29 = vmul.f32 %v99_v28, %v68_v24 }
  0x3c   :  { %76 = vst [vmem:[#allocation7] sm:$0xff] %v75_v29 }
  0x3d   :  { %151 = shalt.err (!%p148_p0)
}
  0x3e   :  { %86 = dma.vmem_to_hbm [thread:$0]  %s84_s1, 128, %s197_s2, [#allocation4]  }
  0x3f   :  { %164 = dma.done.wait [#allocation4], 128  }
  0x40   :  { %165 = vsyncadd [#allocation4], 4294967168 }
  0x41   :  { %90 = vsyncpa [#allocation3], 1 }
  0x42   :  { %91 = vsyncpa [#allocation6], 1 }
  0x43   :  { %92 = vsyncpa [#allocation4], 1 }

</bundles_post_ra>
